<compile_context>
chip_gen: v6e
topology: v6e:2x2x1
jax: 0.10.0
libtpu: 0.0.40
codegen_flags: <defaults>
</compile_context>

<pallas_src>
import functools

import jax
import jax.numpy as jnp
import numpy as np
from jax.experimental import pallas as pl
from jax.experimental.pallas import tpu as pltpu  # noqa: F401  (TPU backend)


def _kernel(x_ref, wf_ref, shift_ref, wfc_ref, bfc_ref, out_ref, *, bb, tv):
    # x_ref: (bb*tv, Cin_pad) with a ones column folded in for the fused bias.
    # wf = w1_pad @ (wg * bn_scale): feature_transform + gcn conv + BN scale
    # fused into a single matmul weight (exact: no nonlinearity in between).
    g = jnp.dot(x_ref[...], wf_ref[...], preferred_element_type=jnp.float32)
    g = jnp.maximum(g + shift_ref[...], 0.0)      # folded gcn bias + BN shift

    # TODO(synk): reference uses AdaptiveAvgPool2d((1, 64)) then Linear(64, NC);
    # flattening that gives 64*64 features which Linear(64, NC) cannot consume,
    # so this implements the intended global average pool over (frames, joints).
    # Per-batch sublane sum on the VPU/XLU (1/TV is folded into wfc); tv is a
    # multiple of 8 here, so the static slices are sublane-aligned.
    pooled = jnp.concatenate(
        [jnp.sum(g[b * tv:(b + 1) * tv, :], axis=0, keepdims=True)
         for b in range(bb)],
        axis=0)                                    # (bb, C)

    # fc: Linear(64, NC); classes lane-padded to 128 for an unmasked store.
    out_ref[...] = (jnp.dot(pooled, wfc_ref[...],
                            preferred_element_type=jnp.float32)
                    + bfc_ref[...])


def prepare_params(params, in_channels, num_frames, num_joints):
    """One-time, input-independent parameter prep (hoisted off the call path)."""
    C = params["w1"].shape[1]
    NC = params["wfc"].shape[1]
    TV = num_frames * num_joints
    Cin = in_channels
    Cin_pad = ((Cin + 1 + 7) // 8) * 8             # room for the ones column

    eps = 1e-5
    scale = (params["bn_gamma"].astype(jnp.float32)
             / jnp.sqrt(params["bn_var"].astype(jnp.float32) + eps))

    # w1 padded to Cin_pad rows, b1 planted on the ones-column row.
    w1p = jnp.zeros((Cin_pad, C), jnp.float32)
    w1p = w1p.at[:Cin, :].set(params["w1"].astype(jnp.float32))
    w1p = w1p.at[Cin, :].set(params["b1"].astype(jnp.float32))

    # Fuse feature_transform with (gcn conv * BN scale):
    #   relu(((x@w1 + b1)@wg + bg)*s + t) == relu(x_pad @ (w1p@(wg*s)) + shift)
    wf = w1p @ (params["wg"].astype(jnp.float32) * scale[None, :])  # (Cin_pad,C)
    shift = (params["bg"].astype(jnp.float32) * scale
             + params["bn_beta"].astype(jnp.float32)
             - params["bn_mean"].astype(jnp.float32) * scale).reshape(1, C)

    # Classifier: lane-pad classes to 128 and fold the 1/TV pooling scale in.
    NC_pad = max(128, ((NC + 127) // 128) * 128)
    wfc = jnp.zeros((C, NC_pad), jnp.float32)
    wfc = wfc.at[:, :NC].set(params["wfc"].astype(jnp.float32) / TV)
    bfc = jnp.zeros((1, NC_pad), jnp.float32)
    bfc = bfc.at[0, :NC].set(params["bfc"].astype(jnp.float32))

    return {"wf": wf, "shift": shift, "wfc": wfc, "bfc": bfc,
            "Cin": Cin, "Cin_pad": Cin_pad, "TV": TV,
            "NC": NC, "NC_pad": NC_pad, "C": C}


def ctr_gcn_forward(x_nchw, prep):
    B, Cin, T, V = x_nchw.shape
    assert Cin == prep["Cin"] and T * V == prep["TV"]
    TV, Cin_pad, NC_pad = prep["TV"], prep["Cin_pad"], prep["NC_pad"]
    rows = B * TV

    # NCHW -> (B*T*V, Cin); one-shot pad [x | ones | zeros] so b1 rides the
    # fused matmul for free and channels hit the 8-sublane multiple.
    xf = jnp.transpose(x_nchw, (0, 2, 3, 1)).reshape(rows, Cin)
    xf = xf.astype(jnp.float32)
    parts = [xf, jnp.ones((rows, 1), jnp.float32)]
    if Cin_pad - Cin - 1 > 0:
        parts.append(jnp.zeros((rows, Cin_pad - Cin - 1), jnp.float32))
    xp = jnp.concatenate(parts, axis=1)

    # Tiny problem (~1 MFLOP, <100 KB traffic): a single step with the whole
    # batch fused and every operand resident in VMEM is launch-bound already;
    # no grid / no cross-TC split.  At real CTR-GCN sizes, add a rows grid
    # axis with an accumulator-style pool and set vmem_limit_bytes.
    out = pl.pallas_call(
        functools.partial(_kernel, bb=B, tv=TV),
        out_shape=jax.ShapeDtypeStruct((B, NC_pad), jnp.float32),
    )(xp, prep["wf"], prep["shift"], prep["wfc"], prep["bfc"])

    return out[:, :prep["NC"]]


def ref_forward(x_nchw, params):
    """Pure-JAX reference of the same semantics (for correctness check)."""
    h = jnp.einsum("bctv,cd->bdtv", x_nchw, params["w1"]) \
        + params["b1"][None, :, None, None]
    g = jnp.einsum("bctv,cd->bdtv", h, params["wg"]) \
        + params["bg"][None, :, None, None]
    eps = 1e-5
    scale = params["bn_gamma"] / jnp.sqrt(params["bn_var"] + eps)
    shift = params["bn_beta"] - params["bn_mean"] * scale
    g = jnp.maximum(g * scale[None, :, None, None]
                    + shift[None, :, None, None], 0.0)
    pooled = jnp.mean(g, axis=(2, 3))                          # (B, C)
    return pooled @ params["wfc"] + params["bfc"]


if __name__ == "__main__":
    B, Cin, T, V, C, NC = 2, 3, 8, 25, 64, 3

    key = jax.random.PRNGKey(0)
    ks = jax.random.split(key, 10)
    params = {
        "w1":  0.1 * jax.random.normal(ks[0], (Cin, C), jnp.float32),
        "b1":  0.1 * jax.random.normal(ks[1], (C,), jnp.float32),
        # Parameters of the dead Q / R branch (output-invisible; unused):
        "wq":  0.1 * jax.random.normal(ks[2], (C, C), jnp.float32),
        "bq":  0.1 * jax.random.normal(ks[3], (C,), jnp.float32),
        "A": jnp.ones((V, V), jnp.float32),
        "alpha": jnp.float32(0.1),
        # gcn / classifier:
        "wg":  0.1 * jax.random.normal(ks[4], (C, C), jnp.float32),
        "bg":  0.1 * jax.random.normal(ks[5], (C,), jnp.float32),
        "wfc": 0.1 * jax.random.normal(ks[6], (C, NC), jnp.float32),
        "bfc": 0.1 * jax.random.normal(ks[7], (NC,), jnp.float32),
        # BatchNorm2d(64) default init (eval-mode running stats)
        "bn_gamma": jnp.ones((C,), jnp.float32),
        "bn_beta":  jnp.zeros((C,), jnp.float32),
        "bn_mean":  jnp.zeros((C,), jnp.float32),
        "bn_var":   jnp.ones((C,), jnp.float32),
    }

    x = jax.random.normal(ks[8], (B, Cin, T, V), jnp.float32)

    prep = prepare_params(params, in_channels=Cin, num_frames=T, num_joints=V)
    logits = ctr_gcn_forward(x, prep)
    jax.block_until_ready(logits)

    expected = ref_forward(x, params)
    np.testing.assert_allclose(np.asarray(logits), np.asarray(expected),
                               rtol=1e-4, atol=1e-4)
    assert logits.shape == (B, NC)
    print("KERNEL_OK")
</pallas_src>

<mosaic_0001>
module attributes {stable_mosaic.version = 11 : i64} {
  func.func @_kernel(%arg0: memref<400x8xf32, #tpu.memory_space<vmem>>, %arg1: memref<8x64xf32, #tpu.memory_space<vmem>>, %arg2: memref<1x64xf32, #tpu.memory_space<vmem>>, %arg3: memref<64x128xf32, #tpu.memory_space<vmem>>, %arg4: memref<1x128xf32, #tpu.memory_space<vmem>>, %arg5: memref<2x128xf32, #tpu.memory_space<vmem>>) attributes {dimension_semantics = [], scalar_prefetch = 0 : i64, scratch_operands = 0 : i64, tpu.core_type = #tpu.core_type<tc>} {
    %c0 = arith.constant 0 : index
    %c0_0 = arith.constant 0 : index
    %0 = vector.load %arg0[%c0, %c0_0] : memref<400x8xf32, #tpu.memory_space<vmem>>, vector<400x8xf32>
    %c0_1 = arith.constant 0 : index
    %c0_2 = arith.constant 0 : index
    %1 = vector.load %arg1[%c0_1, %c0_2] : memref<8x64xf32, #tpu.memory_space<vmem>>, vector<8x64xf32>
    %cst = arith.constant dense<0.000000e+00> : vector<400x64xf32>
    %2 = tpu.matmul %0, %1, %cst {dimension_numbers = #tpu.dot_dimension_numbers<[1], [0], [0], [1], [0, 0, 1, 1], [], []>} : vector<400x8xf32>, vector<8x64xf32>, vector<400x64xf32> -> vector<400x64xf32>
    %c0_3 = arith.constant 0 : index
    %c0_4 = arith.constant 0 : index
    %3 = vector.load %arg2[%c0_3, %c0_4] : memref<1x64xf32, #tpu.memory_space<vmem>>, vector<1x64xf32>
    %4 = vector.broadcast %3 : vector<1x64xf32> to vector<400x64xf32>
    %5 = arith.addf %2, %4 : vector<400x64xf32>
    %cst_5 = arith.constant 0.000000e+00 : f32
    %6 = vector.broadcast %cst_5 : f32 to vector<400x64xf32>
    %7 = arith.maximumf %5, %6 : vector<400x64xf32>
    %8 = vector.extract_strided_slice %7 {offsets = [0, 0], sizes = [200, 64], strides = [1, 1]} : vector<400x64xf32> to vector<200x64xf32>
    %cst_6 = arith.constant dense<0.000000e+00> : vector<64xf32>
    %9 = vector.multi_reduction <add>, %8, %cst_6 [0] : vector<200x64xf32> to vector<64xf32>
    %10 = vector.shape_cast %9 : vector<64xf32> to vector<1x64xf32>
    %11 = vector.extract_strided_slice %7 {offsets = [200, 0], sizes = [200, 64], strides = [1, 1]} : vector<400x64xf32> to vector<200x64xf32>
    %cst_7 = arith.constant dense<0.000000e+00> : vector<64xf32>
    %12 = vector.multi_reduction <add>, %11, %cst_7 [0] : vector<200x64xf32> to vector<64xf32>
    %13 = vector.shape_cast %12 : vector<64xf32> to vector<1x64xf32>
    %14 = tpu.concatenate %10, %13 in 0 : vector<1x64xf32>, vector<1x64xf32> -> vector<2x64xf32>
    %c0_8 = arith.constant 0 : index
    %c0_9 = arith.constant 0 : index
    %15 = vector.load %arg3[%c0_8, %c0_9] : memref<64x128xf32, #tpu.memory_space<vmem>>, vector<64x128xf32>
    %cst_10 = arith.constant dense<0.000000e+00> : vector<2x128xf32>
    %16 = tpu.matmul %14, %15, %cst_10 {dimension_numbers = #tpu.dot_dimension_numbers<[1], [0], [0], [1], [0, 0, 1, 1], [], []>} : vector<2x64xf32>, vector<64x128xf32>, vector<2x128xf32> -> vector<2x128xf32>
    %c0_11 = arith.constant 0 : index
    %c0_12 = arith.constant 0 : index
    %17 = vector.load %arg4[%c0_11, %c0_12] : memref<1x128xf32, #tpu.memory_space<vmem>>, vector<1x128xf32>
    %18 = vector.broadcast %17 : vector<1x128xf32> to vector<2x128xf32>
    %19 = arith.addf %16, %18 : vector<2x128xf32>
    %c0_13 = arith.constant 0 : index
    %c0_14 = arith.constant 0 : index
    %20 = vector.load %arg5[%c0_13, %c0_14] : memref<2x128xf32, #tpu.memory_space<vmem>>, vector<2x128xf32>
    tpu.vector_store %arg5[%c0_13, %c0_14], %19 {strides = array<i32>} : memref<2x128xf32, #tpu.memory_space<vmem>>, vector<2x128xf32>,
    return
  }
}

</mosaic_0001>

<bundles_post_ra>
// kernel: tpu_custom_call.1
= control target key start
LH: loop header
LB: loop body
LE: loop exit
PB: predicated region body
PF: predicated region fallthrough
CT: control target
= control target key end

     0   :  { %vm79_vm0 = vcmask 64512   ;;  %s1476_s0 = inlined_call_operand.vmem [shape: f32[400,8], index: 0, kind: input, shape index: {}]   ;;  %s1477_s1 = inlined_call_operand.vmem [shape: f32[8,64], index: 1, kind: input, shape index: {}]   ;;  %s1478_s2 = inlined_call_operand.vmem [shape: f32[1,64], index: 2, kind: input, shape index: {}]   ;;  %s1479_s3 = inlined_call_operand.vmem [shape: f32[64,128], index: 3, kind: input, shape index: {}]   ;;  %s1480_s4 = inlined_call_operand.vmem [shape: f32[1,128], index: 4, kind: input, shape index: {}]   ;;  %s1481_s5 = inlined_call_operand.hbm [shape: f32[2,128], index: 5, kind: output, shape index: {}]  }
   0x1   :  { %v71_v0 = vld [vmem:[%s1477_s1] sm:$0xff]  ;;  %v22_v2 = vld [vmem:[%s1476_s0 + $0x8] sm:$0xff]  ;;  %v23_v3 = vld [vmem:[%s1476_s0 + $0x10] sm:$0xff] }
   0x2   :  { %v21_v1 = vld [vmem:[%s1476_s0] sm:$0xff]  ;;  %924 = vmatprep.subr.mxu0 %v71_v0  ;;  %1020 = vmatprep.subr.mxu1 %v71_v0  ;;  %v24_v4 = vld [vmem:[%s1476_s0 + $0x18] sm:$0xff]  ;;  %v26_v6 = vld [vmem:[%s1476_s0 + $0x28] sm:$0xff] }
   0x3   :  { %926 = vmatprep.mubr.msk.f32.mxu0 %vm79_vm0, %v21_v1  ;;  %925 = vmatpush3.msra.mxu0 %v71_v0  ;;  %v25_v5 = vld [vmem:[%s1476_s0 + $0x20] sm:$0xff]  ;;  %v47_v7 = vld [vmem:[%s1476_s0 + $0xd0] sm:$0xff]  ;;  %v48_v8 = vld [vmem:[%s1476_s0 + $0xd8] sm:$0xff] }
   0x4   :  { %927 = vmatmul.mubr.msk.f32.vlgmr.msra.gmra.mxu0 %vm79_vm0, %v22_v2  ;;  %1021 = vmatpush3.msra.mxu1 %v71_v0  ;;  %v27_v9 = vld [vmem:[%s1476_s0 + $0x30] sm:$0xff]  ;;  %v49_v10 = vld [vmem:[%s1476_s0 + $0xe0] sm:$0xff]  ;;  %v50_v11 = vld [vmem:[%s1476_s0 + $0xe8] sm:$0xff] }
   0x5   :  { %929 = vmatprep.mubr.msk.f32.mxu0 %vm79_vm0, %v23_v3  ;;  %965 = vmatprep.mubr.msk.f32.mxu1 %vm79_vm0, %v47_v7  ;;  %v28_v12 = vld [vmem:[%s1476_s0 + $0x38] sm:$0xff]  ;;  %v51_v13 = vld [vmem:[%s1476_s0 + $0xf0] sm:$0xff]  ;;  %v29_v14 = vld [vmem:[%s1476_s0 + $0x40] sm:$0xff] }
   0x6   :  { %966 = vmatmul.mubr.msk.f32.vlgmr.msra.gmra.mxu1 %vm79_vm0, %v48_v8  ;;  %v52_v15 = vld [vmem:[%s1476_s0 + $0xf8] sm:$0xff]  ;;  %v30_v16 = vld [vmem:[%s1476_s0 + $0x48] sm:$0xff]  ;;  %v53_v17 = vld [vmem:[%s1476_s0 + $0x100] sm:$0xff] }
   0x7   :  { %968 = vmatprep.mubr.msk.f32.mxu1 %vm79_vm0, %v49_v10  ;;  %v31_v18 = vld [vmem:[%s1476_s0 + $0x50] sm:$0xff] }
   0x8   :  { %930 = vmatmul.mubr.msk.f32.gmra.mxu0 %vm79_vm0, %v24_v4 }
   0x9   :  { %932 = vmatprep.mubr.msk.f32.mxu0 %vm79_vm0, %v25_v5 }
   0xa   :  { %969 = vmatmul.mubr.msk.f32.gmra.mxu1 %vm79_vm0, %v50_v11 }
   0xb   :  { %971 = vmatprep.mubr.msk.f32.mxu1 %vm79_vm0, %v51_v13 }
   0xc   :  { %933 = vmatmul.mubr.msk.f32.gmra.mxu0 %vm79_vm0, %v26_v6 }
   0xd   :  { %935 = vmatprep.mubr.msk.f32.mxu0 %vm79_vm0, %v27_v9 }
  0x10   :  { %936 = vmatmul.mubr.msk.f32.gmra.mxu0 %vm79_vm0, %v28_v12 }
  0x11   :  { %938 = vmatprep.mubr.msk.f32.mxu0 %vm79_vm0, %v29_v14 }
  0x12   :  { %10 = vsyncpa [#allocation3], 0  ;;  %972 = vmatmul.mubr.msk.f32.gmra.mxu1 %vm79_vm0, %v52_v15  ;;  %v54_v19 = vld [vmem:[%s1476_s0 + $0x108] sm:$0xff]  ;;  %v32_v20 = vld [vmem:[%s1476_s0 + $0x58] sm:$0xff]  ;;  %v1047_v52 = vmov 0.0   ;;  %vm1048_vm1 = vmmov 0  }
  0x13   :  { %974 = vmatprep.mubr.msk.f32.mxu1 %vm79_vm0, %v53_v17  ;;  %v55_v21 = vld [vmem:[%s1476_s0 + $0x110] sm:$0xff]  ;;  %v33_v22 = vld [vmem:[%s1476_s0 + $0x60] sm:$0xff]  ;;  %v56_v23 = vld [vmem:[%s1476_s0 + $0x118] sm:$0xff]  ;;  %1001 = vmatprep.subr.mxu1 %v1047_v52  ;;  %vm595_vm2 = vcmask 523264   ;;  %vm706_vm3 = vcmask 1040384   ;;  %s1049_s7 = smov [#allocation2]  }
  0x14   :  { %939 = vmatmul.mubr.msk.f32.gmra.mxu0 %vm79_vm0, %v30_v16  ;;  %v34_v24 = vld [vmem:[%s1476_s0 + $0x68] sm:$0xff]  ;;  %v57_v25 = vld [vmem:[%s1476_s0 + $0x120] sm:$0xff]  ;;  %v35_v26 = vld [vmem:[%s1476_s0 + $0x70] sm:$0xff]  ;;  %s803_s8 = sshll.u32 %s1049_s7, 4  ;;  %s804_s8 = int_to_ptr.vmem [resolvable:$true] %s803_s8 }
  0x15   :  { %941 = vmatprep.mubr.msk.f32.mxu0 %vm79_vm0, %v31_v18  ;;  %v58_v27 = vld [vmem:[%s1476_s0 + $0x128] sm:$0xff]  ;;  %v36_v28 = vld [vmem:[%s1476_s0 + $0x78] sm:$0xff]  ;;  %v59_v29 = vld [vmem:[%s1476_s0 + $0x130] sm:$0xff]  ;;  %s1025_s9 = scalar_lea.vmem %s804_s8, 32  ;;  %p1030_p1 = scmp.lt.s32.totalorder %s804_s8, %s804_s8 }
  0x16   :  { %975 = vmatmul.mubr.msk.f32.gmra.mxu1 %vm79_vm0, %v54_v19  ;;  %v37_v30 = vld [vmem:[%s1476_s0 + $0x80] sm:$0xff]  ;;  %v60_v31 = vld [vmem:[%s1476_s0 + $0x138] sm:$0xff]  ;;  %v38_v32 = vld [vmem:[%s1476_s0 + $0x88] sm:$0xff]  ;;  %p1026_p0 = scmp.ne.s32.totalorder %s804_s8, %s1025_s9  ;;  %p1031_p2 = scmp.lt.s32.totalorder %s1025_s9, %s1025_s9 }
  0x17   :  { %977 = vmatprep.mubr.msk.f32.mxu1 %vm79_vm0, %v55_v21  ;;  %v61_v33 = vld [vmem:[%s1476_s0 + $0x140] sm:$0xff]  ;;  %v39_v34 = vld [vmem:[%s1476_s0 + $0x90] sm:$0xff]  ;;  %v62_v35 = vld [vmem:[%s1476_s0 + $0x148] sm:$0xff] }
  0x18   :  { %942 = vmatmul.mubr.msk.f32.gmra.mxu0 %vm79_vm0, %v32_v20  ;;  %v40_v36 = vld [vmem:[%s1476_s0 + $0x98] sm:$0xff]  ;;  %v63_v37 = vld [vmem:[%s1476_s0 + $0x150] sm:$0xff]  ;;  %v41_v38 = vld [vmem:[%s1476_s0 + $0xa0] sm:$0xff]  ;;  %p1032_p3 = por %p1031_p2, %p1030_p1 }
  0x19   :  { %944 = vmatprep.mubr.msk.f32.mxu0 %vm79_vm0, %v33_v22  ;;  %v64_v39 = vld [vmem:[%s1476_s0 + $0x158] sm:$0xff]  ;;  %v42_v40 = vld [vmem:[%s1476_s0 + $0xa8] sm:$0xff]  ;;  %v65_v41 = vld [vmem:[%s1476_s0 + $0x160] sm:$0xff] }
  0x1a   :  { %978 = vmatmul.mubr.msk.f32.gmra.mxu1 %vm79_vm0, %v56_v23  ;;  %v43_v42 = vld [vmem:[%s1476_s0 + $0xb0] sm:$0xff]  ;;  %v66_v43 = vld [vmem:[%s1476_s0 + $0x168] sm:$0xff]  ;;  %v44_v44 = vld [vmem:[%s1476_s0 + $0xb8] sm:$0xff]  ;;  %p1033_p4 = pnand %p1032_p3, %p1026_p0 }
  0x1b   :  { %980 = vmatprep.mubr.msk.f32.mxu1 %vm79_vm0, %v57_v25  ;;  %v67_v45 = vld [vmem:[%s1476_s0 + $0x170] sm:$0xff]  ;;  %v45_v46 = vld [vmem:[%s1476_s0 + $0xc0] sm:$0xff]  ;;  %v68_v47 = vld [vmem:[%s1476_s0 + $0x178] sm:$0xff] }
  0x1c   :  { %945 = vmatmul.mubr.msk.f32.gmra.mxu0 %vm79_vm0, %v34_v24  ;;  %v46_v48 = vld [vmem:[%s1476_s0 + $0xc8] sm:$0xff]  ;;  %v69_v49 = vld [vmem:[%s1476_s0 + $0x180] sm:$0xff]  ;;  %v715_v51 = vld [vmem:[%s1479_s3 + $0x38] sm:$0xff] }
  0x1d   :  { %947 = vmatprep.mubr.msk.f32.mxu0 %vm79_vm0, %v35_v26  ;;  %v70_v50 = vld [vmem:[%s1476_s0 + $0x188] sm:$0xff]  ;;  %1002 = vmatpush3.msra.mxu1 %v715_v51  ;;  %v714_v53 = vld [vmem:[%s1479_s3 + $0x30] sm:$0xff]  ;;  %v712_v55 = vld [vmem:[%s1479_s3 + $0x20] sm:$0xff] }
  0x1e   :  { %981 = vmatmul.mubr.msk.f32.gmra.mxu1 %vm79_vm0, %v58_v27  ;;  %1003 = vmatprep.subr.mxu1 %v1047_v52  ;;  %v713_v54 = vld [vmem:[%s1479_s3 + $0x28] sm:$0xff]  ;;  %v711_v56 = vld [vmem:[%s1479_s3 + $0x18] sm:$0xff]  ;;  %v710_v57 = vld [vmem:[%s1479_s3 + $0x10] sm:$0xff] }
  0x1f   :  { %983 = vmatprep.mubr.msk.f32.mxu1 %vm79_vm0, %v59_v29  ;;  %1004 = vmatpush3.msra.mxu1 %v714_v53  ;;  %v709_v58 = vld [vmem:[%s1479_s3 + $0x8] sm:$0xff]  ;;  %v708_v59 = vld [vmem:[%s1479_s3] sm:$0xff] }
  0x20   :  { %948 = vmatmul.mubr.msk.f32.gmra.mxu0 %vm79_vm0, %v36_v28  ;;  %1005 = vmatprep.subr.mxu1 %v1047_v52  ;;  %v1310_v60 = vld [vmem:[%s1478_s2] ss:$0 sm:$0xff] }
  0x21   :  { %950 = vmatprep.mubr.msk.f32.mxu0 %vm79_vm0, %v37_v30  ;;  %1006 = vmatpush3.msra.mxu1 %v713_v54 }
  0x22   :  { %984 = vmatmul.mubr.msk.f32.gmra.mxu1 %vm79_vm0, %v60_v31  ;;  %1007 = vmatprep.subr.mxu1 %v1047_v52 }
  0x23   :  { %986 = vmatprep.mubr.msk.f32.mxu1 %vm79_vm0, %v61_v33  ;;  %1008 = vmatpush3.msra.mxu1 %v712_v55 }
  0x24   :  { %951 = vmatmul.mubr.msk.f32.gmra.mxu0 %vm79_vm0, %v38_v32  ;;  %1009 = vmatprep.subr.mxu1 %v1047_v52 }
  0x25   :  { %953 = vmatprep.mubr.msk.f32.mxu0 %vm79_vm0, %v39_v34  ;;  %1010 = vmatpush3.msra.mxu1 %v711_v56 }
  0x26   :  { %987 = vmatmul.mubr.msk.f32.gmra.mxu1 %vm79_vm0, %v62_v35  ;;  %1011 = vmatprep.subr.mxu1 %v1047_v52 }
  0x27   :  { %989 = vmatprep.mubr.msk.f32.mxu1 %vm79_vm0, %v63_v37  ;;  %1012 = vmatpush3.msra.mxu1 %v710_v57 }
  0x28   :  { %954 = vmatmul.mubr.msk.f32.gmra.mxu0 %vm79_vm0, %v40_v36  ;;  %1013 = vmatprep.subr.mxu1 %v1047_v52 }
  0x29   :  { %956 = vmatprep.mubr.msk.f32.mxu0 %vm79_vm0, %v41_v38  ;;  %1014 = vmatpush3.msra.mxu1 %v709_v58 }
  0x2a   :  { %990 = vmatmul.mubr.msk.f32.gmra.mxu1 %vm79_vm0, %v64_v39  ;;  %1015 = vmatprep.subr.mxu1 %v1047_v52 }
  0x2b   :  { %992 = vmatprep.mubr.msk.f32.mxu1 %vm79_vm0, %v65_v41  ;;  %1016 = vmatpush3.msra.mxu1 %v708_v59 }
  0x2c   :  { %957 = vmatmul.mubr.msk.f32.gmra.mxu0 %vm79_vm0, %v42_v40 }
  0x2d   :  { %959 = vmatprep.mubr.msk.f32.mxu0 %vm79_vm0, %v43_v42 }
  0x2e   :  { %993 = vmatmul.mubr.msk.f32.gmra.mxu1 %vm79_vm0, %v66_v43 }
  0x2f   :  { %995 = vmatprep.mubr.msk.f32.mxu1 %vm79_vm0, %v67_v45 }
  0x30   :  { %960 = vmatmul.mubr.msk.f32.gmra.mxu0 %vm79_vm0, %v44_v44 }
  0x31   :  { %962 = vmatprep.mubr.msk.f32.mxu0 %vm79_vm0, %v45_v46 }
  0x32   :  { %996 = vmatmul.mubr.msk.f32.gmra.mxu1 %vm79_vm0, %v68_v47 }
  0x33   :  { %998 = vmatprep.mubr.msk.f32.mxu1 %vm79_vm0, %v69_v49 }
  0x34   :  { %963 = vmatmul.mubr.msk.f32.gmra.mxu0 %vm79_vm0, %v46_v48 }
  0x36   :  { %999 = vmatmul.mubr.msk.f32.gmra.mxu1 %vm79_vm0, %v70_v50 }
  0x37   :  { %1017 = vmatprep.mubr.msk.f32.mxu1 %vm1048_vm1, %v1047_v52 }
  0xc4   :  { %v928_v61 = vpop.f32.mrf.mxu0 }
  0xc5   :  { %v302_v62 = vadd.f32 %v928_v61, %v1310_v60 }
  0xc6   :  { %v296_v63 = vpop.f32.mrf.mxu0  ;;  %v1317_v8 = vpop.f32.mrf.mxu1 }
  0xc7   :  { %v297_v0 = vadd.f32 %v1310_v60, %v296_v63  ;;  %v546_v2 = vmax.f32 %v302_v62, 0.0 }
  0xc8   :  { %v931_v1 = vpop.f32.mrf.mxu0  ;;  %v1321_v14 = vpop.f32.mrf.mxu1 }
  0xc9   :  { %v545_v3 = vmax.f32 %v297_v0, 0.0  ;;  %v312_v4 = vadd.f32 %v931_v1, %v1310_v60  ;;  %v597_v10 = vsel %vm595_vm2, %v546_v2, 0.0 }
  0xca   :  { %v306_v5 = vpop.f32.mrf.mxu0  ;;  %v1325_v19 = vpop.f32.mrf.mxu1 }
  0xcb   :  { %v596_v6 = vsel %vm595_vm2, %v545_v3, 0.0  ;;  %v307_v7 = vadd.f32 %v1310_v60, %v306_v5  ;;  %v548_v11 = vmax.f32 %v312_v4, 0.0 }
  0xcc   :  { %v934_v9 = vpop.f32.mrf.mxu0  ;;  %v598_v15 = vadd.f32 %v597_v10, %v596_v6  ;;  %v1329_v26 = vpop.f32.mrf.mxu1 }
  0xcd   :  { %v547_v12 = vmax.f32 %v307_v7, 0.0  ;;  %v322_v13 = vadd.f32 %v934_v9, %v1310_v60  ;;  %v601_v22 = vsel %vm595_vm2, %v548_v11, 0.0 }
  0xce   :  { %v316_v16 = vpop.f32.mrf.mxu0 }
  0xcf   :  { %v599_v17 = vsel %vm595_vm2, %v547_v12, 0.0  ;;  %v317_v18 = vadd.f32 %v1310_v60, %v316_v16  ;;  %v550_v23 = vmax.f32 %v322_v13, 0.0 }
  0xd0   :  { %v600_v20 = vadd.f32 %v599_v17, %v598_v15  ;;  %v937_v21 = vpop.f32.mrf.mxu0 }
  0xd1   :  { %v549_v24 = vmax.f32 %v317_v18, 0.0  ;;  %v332_v25 = vadd.f32 %v937_v21, %v1310_v60  ;;  %v605_v34 = vsel %vm595_vm2, %v550_v23, 0.0 }
  0xd2   :  { %v602_v27 = vadd.f32 %v601_v22, %v600_v20  ;;  %v326_v28 = vpop.f32.mrf.mxu0  ;;  %v1333_v31 = vpop.f32.mrf.mxu1 }
  0xd3   :  { %v603_v29 = vsel %vm595_vm2, %v549_v24, 0.0  ;;  %v327_v30 = vadd.f32 %v1310_v60, %v326_v28  ;;  %v552_v35 = vmax.f32 %v332_v25, 0.0 }
  0xd4   :  { %v604_v32 = vadd.f32 %v603_v29, %v602_v27  ;;  %v940_v33 = vpop.f32.mrf.mxu0  ;;  %v1336_v37 = vpop.f32.mrf.mxu1 }
  0xd5   :  { %v551_v36 = vmax.f32 %v327_v30, 0.0  ;;  %v342_v41 = vadd.f32 %v940_v33, %v1310_v60  ;;  %v609_v46 = vsel %vm595_vm2, %v552_v35, 0.0  ;;  %v427_v33 = vadd.f32 %v1310_v60, %v1321_v14 }
  0xd6   :  { %v606_v38 = vadd.f32 %v605_v34, %v604_v32  ;;  %v336_v39 = vpop.f32.mrf.mxu0  ;;  %v1341_v43 = vpop.f32.mrf.mxu1  ;;  %v437_v14 = vadd.f32 %v1310_v60, %v1329_v26 }
  0xd7   :  { %v607_v40 = vsel %vm595_vm2, %v551_v36, 0.0  ;;  %v337_v42 = vadd.f32 %v1310_v60, %v336_v39  ;;  %v554_v51 = vmax.f32 %v342_v41, 0.0 }
  0xd8   :  { %v608_v44 = vadd.f32 %v607_v40, %v606_v38  ;;  %v943_v45 = vpop.f32.mrf.mxu0  ;;  %v1344_v50 = vpop.f32.mrf.mxu1  ;;  %v432_v40 = vadd.f32 %v1317_v8, %v1310_v60 }
  0xd9   :  { %v553_v47 = vmax.f32 %v337_v42, 0.0  ;;  %v613_v59 = vsel %vm595_vm2, %v554_v51, 0.0  ;;  %v352_v61 = vadd.f32 %v943_v45, %v1310_v60  ;;  %v571_v42 = vmax.f32 %v427_v33, 0.0 }
  0xda   :  { %v610_v48 = vadd.f32 %v609_v46, %v608_v44  ;;  %v346_v49 = vpop.f32.mrf.mxu0  ;;  %v1348_v58 = vpop.f32.mrf.mxu1 }
  0xdb   :  { %v611_v52 = vsel %vm595_vm2, %v553_v47, 0.0  ;;  %v347_v53 = vadd.f32 %v1310_v60, %v346_v49  ;;  %v556_v4 = vmax.f32 %v352_v61, 0.0  ;;  %v442_v47 = vadd.f32 %v1325_v19, %v1310_v60 }
  0xdc   :  { %v612_v54 = vadd.f32 %v611_v52, %v610_v48  ;;  %v946_v55 = vpop.f32.mrf.mxu0  ;;  %v1354_v3 = vpop.f32.mrf.mxu1  ;;  %v572_v52 = vmax.f32 %v432_v40, 0.0 }
  0xdd   :  { %v555_v56 = vmax.f32 %v347_v53, 0.0  ;;  %v617_v11 = vsel %vm595_vm2, %v556_v4, 0.0  ;;  %v362_v12 = vadd.f32 %v946_v55, %v1310_v60  ;;  %v447_v55 = vadd.f32 %v1310_v60, %v1336_v37 }
  0xde   :  { %v356_v57 = vpop.f32.mrf.mxu0  ;;  %v614_v62 = vadd.f32 %v613_v59, %v612_v54  ;;  %v1356_v10 = vpop.f32.mrf.mxu1  ;;  %v652_v54 = vsel %vm595_vm2, %v571_v42, 0.0  ;;  %v574_v61 = vmax.f32 %v442_v47, 0.0 }
  0xdf   :  { %v615_v0 = vsel %vm595_vm2, %v555_v56, 0.0  ;;  %v357_v1 = vadd.f32 %v1310_v60, %v356_v57  ;;  %v558_v21 = vmax.f32 %v362_v12, 0.0  ;;  %v573_v57 = vmax.f32 %v437_v14, 0.0 }
  0xe0   :  { %v949_v63 = vpop.f32.mrf.mxu0  ;;  %v616_v5 = vadd.f32 %v615_v0, %v614_v62  ;;  %v1362_v20 = vpop.f32.mrf.mxu1  ;;  %v654_v0 = vsel %vm595_vm2, %v572_v52, 0.0 }
  0xe1   :  { %v557_v7 = vmax.f32 %v357_v1, 0.0  ;;  %v621_v28 = vsel %vm595_vm2, %v558_v21, 0.0  ;;  %v372_v29 = vadd.f32 %v949_v63, %v1310_v60  ;;  %v452_v1 = vadd.f32 %v1333_v31, %v1310_v60 }
  0xe2   :  { %v366_v2 = vpop.f32.mrf.mxu0  ;;  %v618_v13 = vadd.f32 %v617_v11, %v616_v5  ;;  %v1366_v27 = vpop.f32.mrf.mxu1  ;;  %v575_v5 = vmax.f32 %v447_v55, 0.0  ;;  %v462_v31 = vadd.f32 %v1341_v43, %v1310_v60  ;;  %v472_v43 = vadd.f32 %v1348_v58, %v1310_v60 }
  0xe3   :  { %v619_v16 = vsel %vm595_vm2, %v557_v7, 0.0  ;;  %v367_v17 = vadd.f32 %v1310_v60, %v366_v2  ;;  %v560_v39 = vmax.f32 %v372_v29, 0.0  ;;  %v457_v7 = vadd.f32 %v1310_v60, %v1344_v50 }
  0xe4   :  { %v952_v6 = vpop.f32.mrf.mxu0  ;;  %v620_v22 = vadd.f32 %v619_v16, %v618_v13  ;;  %v1378_v38 = vpop.f32.mrf.mxu1  ;;  %v467_v29 = vadd.f32 %v1310_v60, %v1354_v3  ;;  %v482_v3 = vadd.f32 %v1356_v10, %v1310_v60 }
  0xe5   :  { %v559_v24 = vmax.f32 %v367_v17, 0.0  ;;  %v625_v49 = vsel %vm595_vm2, %v560_v39, 0.0  ;;  %v382_v51 = vadd.f32 %v952_v6, %v1310_v60  ;;  %v656_v6 = vsel %vm595_vm2, %v573_v57, 0.0 }
  0xe6   :  { %v376_v9 = vpop.f32.mrf.mxu0  ;;  %v622_v30 = vadd.f32 %v621_v28, %v620_v22  ;;  %v1387_v48 = vpop.f32.mrf.mxu1  ;;  %v576_v17 = vmax.f32 %v452_v1, 0.0  ;;  %v660_v22 = vsel %vm595_vm2, %v575_v5, 0.0  ;;  %v577_v28 = vmax.f32 %v457_v7, 0.0 }
  0xe7   :  { %v623_v34 = vsel %vm595_vm2, %v559_v24, 0.0  ;;  %v377_v35 = vadd.f32 %v1310_v60, %v376_v9  ;;  %v562_v63 = vmax.f32 %v382_v51, 0.0  ;;  %v658_v9 = vsel %vm595_vm2, %v574_v61, 0.0 }
  0xe8   :  { %v955_v15 = vpop.f32.mrf.mxu0  ;;  %v624_v41 = vadd.f32 %v623_v34, %v622_v30  ;;  %v496_v62 = vpop.f32.mrf.mxu1  ;;  %v664_v42 = vsel %vm595_vm2, %v577_v28, 0.0  ;;  %v492_v57 = vadd.f32 %v1366_v27, %v1310_v60  ;;  %v502_v27 = vadd.f32 %v1387_v48, %v1310_v60 }
  0xe9   :  { %v561_v45 = vmax.f32 %v377_v35, 0.0  ;;  %v629_v13 = vsel %vm595_vm2, %v562_v63, 0.0  ;;  %v392_v16 = vadd.f32 %v955_v15, %v1310_v60  ;;  %v662_v15 = vsel %vm595_vm2, %v576_v17, 0.0 }
  0xea   :  { %v386_v18 = vpop.f32.mrf.mxu0  ;;  %v626_v53 = vadd.f32 %v625_v49, %v624_v41  ;;  %v1404_v12 = vpop.f32.mrf.mxu1  ;;  %v578_v35 = vmax.f32 %v462_v31, 0.0  ;;  %v580_v49 = vmax.f32 %v472_v43, 0.0  ;;  %v584_v7 = vmax.f32 %v492_v57, 0.0 }
  0xeb   :  { %v627_v56 = vsel %vm595_vm2, %v561_v45, 0.0  ;;  %v387_v26 = vadd.f32 %v1310_v60, %v386_v18  ;;  %v564_v34 = vmax.f32 %v392_v16, 0.0  ;;  %v512_v48 = vadd.f32 %v1404_v12, %v1310_v60 }
  0xec   :  { %v1364_v23 = vpop.f32.mrf.mxu0  ;;  %v628_v2 = vadd.f32 %v627_v56, %v626_v53  ;;  %v506_v33 = vpop.f32.mrf.mxu1  ;;  %v666_v58 = vsel %vm595_vm2, %v578_v35, 0.0  ;;  %v582_v56 = vmax.f32 %v482_v3, 0.0 }
  0xed   :  { %v563_v37 = vmax.f32 %v387_v26, 0.0  ;;  %v633_v14 = vsel %vm595_vm2, %v564_v34, 0.0  ;;  %v402_v47 = vadd.f32 %v1364_v23, %v1310_v60  ;;  %v507_v31 = vadd.f32 %v1310_v60, %v506_v33 }
  0xee   :  { %v396_v25 = vpop.f32.mrf.mxu0  ;;  %v630_v18 = vadd.f32 %v629_v13, %v628_v2  ;;  %v674_v2 = vsel %vm595_vm2, %v582_v56, 0.0 }
  0xef   :  { %v631_v24 = vsel %vm595_vm2, %v563_v37, 0.0  ;;  %v397_v50 = vadd.f32 %v1310_v60, %v396_v25  ;;  %v477_v25 = vadd.f32 %v1310_v60, %v1362_v20  ;;  %v566_v23 = vmax.f32 %v402_v47, 0.0 }
  0xf0   :  { %v1370_v32 = vpop.f32.mrf.mxu0  ;;  %v632_v39 = vadd.f32 %v631_v24, %v630_v18  ;;  %v586_v24 = vmax.f32 %v502_v27, 0.0  ;;  %v587_v34 = vmax.f32 %v507_v31, 0.0 }
  0xf1   :  { %v565_v41 = vmax.f32 %v397_v50, 0.0  ;;  %v637_v37 = vsel %vm595_vm2, %v566_v23, 0.0 }
  0xf2   :  { %v1376_v36 = vpop.f32.mrf.mxu0  ;;  %v634_v51 = vadd.f32 %v633_v14, %v632_v39  ;;  %v682_v39 = vsel %vm595_vm2, %v586_v24, 0.0 }
  0xf3   :  { %v635_v20 = vsel %vm595_vm2, %v565_v41, 0.0  ;;  %v407_v53 = vadd.f32 %v1310_v60, %v1376_v36  ;;  %v497_v36 = vadd.f32 %v1310_v60, %v496_v62 }
  0xf4   :  { %v964_v44 = vpop.f32.mrf.mxu0 }
  0xf5   :  { %v422_v46 = vadd.f32 %v964_v44, %v1310_v60  ;;  %v579_v44 = vmax.f32 %v467_v29, 0.0  ;;  %v567_v63 = vmax.f32 %v407_v53, 0.0  ;;  %v585_v17 = vmax.f32 %v497_v36, 0.0 }
  0xf6   :  { %v416_v1 = vpop.f32.mrf.mxu0 }
  0xf7   :  { %v570_v8 = vmax.f32 %v422_v46, 0.0  ;;  %v994_v46 = vpop.f32.mrf.mxu1  ;;  %v668_v10 = vsel %vm595_vm2, %v579_v44, 0.0  ;;  %v639_v62 = vsel %vm595_vm2, %v567_v63, 0.0  ;;  %v417_v16 = vadd.f32 %v1310_v60, %v416_v1 }
  0xf8   :  { %v522_v41 = vadd.f32 %v994_v46, %v1310_v60 }
  0xf9   :  { %v651_v19 = vsel %vm595_vm2, %v570_v8, 0.0  ;;  %v487_v8 = vadd.f32 %v1310_v60, %v1378_v38  ;;  %v516_v26 = vpop.f32.mrf.mxu1  ;;  %v569_v29 = vmax.f32 %v417_v16, 0.0 }
  0xfa   :  { %v653_v59 = vadd.f32 %v652_v54, %v651_v19  ;;  %v581_v54 = vmax.f32 %v477_v25, 0.0  ;;  %v670_v19 = vsel %vm595_vm2, %v580_v49, 0.0  ;;  %v684_v25 = vsel %vm595_vm2, %v587_v34, 0.0 }
  0xfb   :  { %v583_v38 = vmax.f32 %v487_v8, 0.0  ;;  %v997_v5 = vpop.f32.mrf.mxu1  ;;  %v643_v12 = vsel %vm595_vm2, %v569_v29, 0.0  ;;  %v590_v49 = vmax.f32 %v522_v41, 0.0 }
  0xfc   :  { %v655_v4 = vadd.f32 %v654_v0, %v653_v59  ;;  %v636_v59 = vadd.f32 %v635_v20, %v634_v51  ;;  %v672_v0 = vsel %vm595_vm2, %v581_v54, 0.0  ;;  %v532_v51 = vadd.f32 %v997_v5, %v1310_v60 }
  0xfd   :  { %v676_v13 = vsel %vm595_vm2, %v583_v38, 0.0  ;;  %v690_v54 = vsel %vm595_vm2, %v590_v49, 0.0 }
  0xfe   :  { %v657_v11 = vadd.f32 %v656_v6, %v655_v4  ;;  %v412_v6 = vadd.f32 %v1370_v32, %v1310_v60  ;;  %v678_v32 = vsel %vm595_vm2, %v584_v7, 0.0 }
 0x100   :  { %v659_v21 = vadd.f32 %v658_v9, %v657_v11  ;;  %v638_v9 = vadd.f32 %v637_v37, %v636_v59 }
 0x102   :  { %v661_v30 = vadd.f32 %v660_v22, %v659_v21  ;;  %v526_v21 = vpop.f32.mrf.mxu1  ;;  %v568_v22 = vmax.f32 %v412_v6, 0.0  ;;  %v640_v50 = vadd.f32 %v639_v62, %v638_v9 }
 0x103   :  { %v527_v3 = vadd.f32 %v1310_v60, %v526_v21 }
 0x104   :  { %v663_v40 = vadd.f32 %v662_v15, %v661_v30  ;;  %v680_v30 = vsel %vm595_vm2, %v585_v17, 0.0  ;;  %v517_v15 = vadd.f32 %v1310_v60, %v516_v26  ;;  %v1000_v43 = vpop.f32.mrf.mxu1  ;;  %v641_v33 = vsel %vm595_vm2, %v568_v22, 0.0  ;;  %v862_v17 = vld [vmem:[%s1480_s4] ss:$0 sm:$0xff] }
 0x105   :  { %v591_v20 = vmax.f32 %v527_v3, 0.0  ;;  %v542_v56 = vadd.f32 %v1000_v43, %v1310_v60 }
 0x106   :  { %v665_v45 = vadd.f32 %v664_v42, %v663_v40  ;;  %v588_v40 = vmax.f32 %v512_v48, 0.0  ;;  %v642_v42 = vadd.f32 %v641_v33, %v640_v50  ;;  %v536_v47 = vpop.f32.mrf.mxu1 }
 0x107   :  { %v537_v53 = vadd.f32 %v1310_v60, %v536_v47  ;;  %v594_v38 = vmax.f32 %v542_v56, 0.0 }
 0x108   :  { %v667_v52 = vadd.f32 %v666_v58, %v665_v45  ;;  %v589_v45 = vmax.f32 %v517_v15, 0.0  ;;  %v686_v58 = vsel %vm595_vm2, %v588_v40, 0.0 }
 0x109   :  { %v593_v57 = vmax.f32 %v537_v53, 0.0 }
 0x10a   :  { %v669_v55 = vadd.f32 %v668_v10, %v667_v52  ;;  %v644_v52 = vadd.f32 %v643_v12, %v642_v42  ;;  %v688_v46 = vsel %vm595_vm2, %v589_v45, 0.0 }
 0x10b   :  { %v696_v36 = vsel %vm595_vm2, %v593_v57, 0.0 }
 0x10c   :  { %v671_v61 = vadd.f32 %v670_v19, %v669_v55  ;;  %v592_v55 = vmax.f32 %v532_v51, 0.0  ;;  %v645_v26 = vrot.slane %v644_v52, 4  ;;  %v692_v19 = vsel %vm595_vm2, %v591_v20, 0.0 }
 0x10e   :  { %v673_v4 = vadd.f32 %v672_v0, %v671_v61  ;;  %v694_v61 = vsel %vm595_vm2, %v592_v55, 0.0  ;;  %v646_v63 = vadd.f32 %v645_v26, %v644_v52 }
 0x110   :  { %v675_v11 = vadd.f32 %v674_v2, %v673_v4  ;;  %v698_v2 = vsel %vm595_vm2, %v594_v38, 0.0  ;;  %v647_v4 = vrot.slane %v646_v63, 2 }
 0x112   :  { %v677_v18 = vadd.f32 %v676_v13, %v675_v11  ;;  %v648_v60 = vadd.f32 %v647_v4, %v646_v63 }
 0x114   :  { %v679_v28 = vadd.f32 %v678_v32, %v677_v18  ;;  %v649_v27 = vrot.slane %v648_v60, 1 }
 0x116   :  { %v681_v35 = vadd.f32 %v680_v30, %v679_v28  ;;  %v650_v13 = vadd.f32 %v649_v27, %v648_v60 }
 0x118   :  { %v683_v44 = vadd.f32 %v682_v39, %v681_v35 }
 0x11a   :  { %v685_v14 = vadd.f32 %v684_v25, %v683_v44 }
 0x11c   :  { %v687_v8 = vadd.f32 %v686_v58, %v685_v14 }
 0x11e   :  { %v689_v10 = vadd.f32 %v688_v46, %v687_v8 }
 0x120   :  { %v691_v23 = vadd.f32 %v690_v54, %v689_v10 }
 0x122   :  { %v693_v59 = vadd.f32 %v692_v19, %v691_v23 }
 0x124   :  { %v695_v0 = vadd.f32 %v694_v61, %v693_v59 }
 0x126   :  { %v697_v1 = vadd.f32 %v696_v36, %v695_v0 }
 0x128   :  { %v699_v5 = vadd.f32 %v698_v2, %v697_v1 }
 0x12a   :  { %v700_v37 = vrot.slane %v699_v5, 4 }
 0x12c   :  { %v701_v6 = vadd.f32 %v700_v37, %v699_v5 }
 0x12e   :  { %v702_v7 = vrot.slane %v701_v6, 2 }
 0x130   :  { %v703_v9 = vadd.f32 %v702_v7, %v701_v6 }
 0x132   :  { %v704_v11 = vrot.slane %v703_v9, 1 }
 0x134   :  { %v705_v62 = vadd.f32 %v704_v11, %v703_v9 }
 0x136   :  { %v707_v16 = vsel %vm706_vm3, %v650_v13, %v705_v62 }
 0x137   :  { %1018 = vmatmul.mubr.msk.f32.vlgmr.msra.gmra.mxu1 %vm595_vm2, %v707_v16 }
 0x1f7   :  { %v792_v31 = vpop.f32.mrf.mxu1 }
 0x1f8   :  { %v793_v18 = vadd.f32 %v862_v17, %v792_v31 }
 0x1f9   :  { %v1019_v21 = vpop.f32.mrf.mxu1 }
 0x1fa   :  { %796 = vst [vmem:[#allocation2] sm:$0x3] %v793_v18 }
 0x1fb   :  { %1036 = shalt.err (!%p1033_p4)
}
 0x1fc   :  { %806 = dma.vmem_to_hbm [thread:$0]  %s804_s8, 32, %s1481_s5, [#allocation3]  }
 0x1fd   :  { %1045 = dma.done.wait [#allocation3], 32  }
 0x1fe   :  { %1046 = vsyncadd [#allocation3], 4294967264 }
 0x1ff   :  { %810 = vsyncpa [#allocation3], 1 }

</bundles_post_ra>
